<compile_context>
chip_gen: v7x
topology: tpu7x:2x2x1
jax: 0.10.0
libtpu: 0.0.40
codegen_flags: <defaults>
</compile_context>

<pallas_src>
import jax
import jax.numpy as jnp
from jax import lax
from jax.experimental import pallas as pl
from jax.experimental.pallas import tpu as pltpu


def _round_up(x: int, m: int) -> int:
    return (x + m - 1) // m * m


def _pick_tile(dim: int, cap: int, align: int):
    """Returns (tile, padded_dim).

    If `dim` fits one block (<= cap) the tile is the full dimension — legal for
    any size (block == full array dim) and needs no padding.  Otherwise pick
    the smallest `align`-multiple tile that keeps the block count at
    ceil(dim/cap), minimizing zero padding.
    """
    if dim <= cap:
        return dim, dim
    nblk = -(-dim // cap)
    tile = _round_up(-(-dim // nblk), align)
    return tile, _round_up(dim, tile)


def _linear_kernel_acc(x_ref, w_ref, o_ref, acc_ref):
    # x_ref: [tm, tk], w_ref: [tn, tk] (PyTorch layout, contract over last
    # dims -> no HBM-side transpose), o_ref: [tm, tn], acc_ref: [tm, tn] f32.
    k = pl.program_id(2)

    @pl.when(k == 0)
    def _init():
        acc_ref[...] = jnp.zeros_like(acc_ref)

    acc_ref[...] += lax.dot_general(
        x_ref[...],
        w_ref[...],
        dimension_numbers=(((1,), (1,)), ((), ())),
        preferred_element_type=jnp.float32,
    )

    @pl.when(k == pl.num_programs(2) - 1)
    def _store():
        o_ref[...] = acc_ref[...].astype(o_ref.dtype)


def _linear_kernel_noacc(x_ref, w_ref, o_ref):
    # Single K block: no accumulator scratch / pl.when on the critical path.
    o_ref[...] = lax.dot_general(
        x_ref[...],
        w_ref[...],
        dimension_numbers=(((1,), (1,)), ((), ())),
        preferred_element_type=jnp.float32,
    ).astype(o_ref.dtype)


@jax.jit
def linear_forward(x, weight):
    """Computes x @ weight.T (nn.Linear, bias=False).

    Args:
      x:      [B, D] (or [D]) activations.
      weight: [A, D] weight matrix in PyTorch nn.Linear layout.

    Returns:
      [B, A] (or [A]) action values, dtype of x.
    """
    squeeze = x.ndim == 1
    if squeeze:
        x = x[None, :]

    B, D = x.shape
    A, D2 = weight.shape
    assert D == D2, (D, D2)

    x_isz = x.dtype.itemsize
    w_isz = weight.dtype.itemsize
    # Sublane alignment for split M blocks: 8 (f32), 16 (bf16), 32 (8-bit).
    sub_align = {4: 8, 2: 16, 1: 32}.get(x_isz, 8)

    # Tile caps: big blocks amortize grid-step overhead and cut cross-tile
    # re-streaming; footprint at the caps fits every generation's VMEM.
    cap_m, cap_n, cap_k = 512, 512, 1024

    tm, Bp = _pick_tile(B, cap_m, sub_align)
    tn, Ap = _pick_tile(A, cap_n, 128)
    tk, Dp = _pick_tile(D, cap_k, 128)

    # Pad only when a dim was actually split and is not a tile multiple.
    # Zero-padding along K is numerically exact; padded B/A are sliced off.
    xp = x if (Bp, Dp) == (B, D) else jnp.pad(x, ((0, Bp - B), (0, Dp - D)))
    wp = (
        weight
        if (Ap, Dp) == (A, D)
        else jnp.pad(weight, ((0, Ap - A), (0, Dp - D)))
    )

    gm, gn, gk = Bp // tm, Ap // tn, Dp // tk
    grid = (gm, gn, gk)

    if gk == 1:
        kernel = _linear_kernel_noacc
        scratch = []
        acc_bytes = 0
    else:
        kernel = _linear_kernel_acc
        scratch = [pltpu.VMEM((tm, tn), jnp.float32)]
        acc_bytes = 4 * tm * tn

    out_dtype = x.dtype
    out_isz = jnp.dtype(out_dtype).itemsize

    # Scoped-VMEM request derived from the actual tile footprint
    # (double-buffered inputs/output + accumulator) with 2x headroom, clamped
    # to stay comfortably inside v7x's 64 MiB physical VMEM.
    footprint = (
        2 * tm * tk * x_isz + 2 * tn * tk * w_isz + 2 * tm * tn * out_isz + acc_bytes
    )
    vmem_limit = int(min(max(2 * footprint, 16 << 20), 48 << 20))

    cost = pl.CostEstimate(
        flops=2 * B * D * A,
        transcendentals=0,
        bytes_accessed=B * D * x_isz + A * D * w_isz + B * A * out_isz,
    )

    out_p = pl.pallas_call(
        kernel,
        out_shape=jax.ShapeDtypeStruct((Bp, Ap), out_dtype),
        grid_spec=pltpu.PrefetchScalarGridSpec(
            num_scalar_prefetch=0,
            grid=grid,
            in_specs=[
                pl.BlockSpec((tm, tk), lambda i, j, k: (i, k)),
                # Weight kept in [A, D] layout: block (tn, tk) indexed (j, k).
                pl.BlockSpec((tn, tk), lambda i, j, k: (j, k)),
            ],
            out_specs=pl.BlockSpec((tm, tn), lambda i, j, k: (i, j)),
            scratch_shapes=scratch,
        ),
        compiler_params=pltpu.CompilerParams(
            # M/N independent -> megacore-shardable; only K must be sequential.
            dimension_semantics=("parallel", "parallel", "arbitrary"),
            vmem_limit_bytes=vmem_limit,
        ),
        cost_estimate=cost,
    )(xp, wp)

    if (Bp, Ap) != (B, A):
        out_p = out_p[:B, :A]
    return out_p[0] if squeeze else out_p


if __name__ == "__main__":
    input_dimension = 128
    n_actions = 4
    batch = 8

    key = jax.random.PRNGKey(0)
    kx, kw = jax.random.split(key)

    # Deterministic init mimicking nn.Linear's uniform(-1/sqrt(D), 1/sqrt(D)).
    bound = 1.0 / (input_dimension ** 0.5)
    weight = jax.random.uniform(
        kw, (n_actions, input_dimension), jnp.float32, minval=-bound, maxval=bound
    )
    x = jax.random.normal(kx, (batch, input_dimension), jnp.float32)

    # --- f32 toy shape (single-block fast path, no padding, no transpose) ---
    actions = jax.block_until_ready(linear_forward(x, weight))
    ref = x @ weight.T
    assert actions.shape == (batch, n_actions), actions.shape
    assert jnp.allclose(actions, ref, atol=1e-4, rtol=1e-4)

    # --- bf16 inputs, f32 accumulation (MXU-native fast dtype path) ---------
    xb, wb = x.astype(jnp.bfloat16), weight.astype(jnp.bfloat16)
    actions_bf16 = jax.block_until_ready(linear_forward(xb, wb))
    ref_bf16 = xb.astype(jnp.float32) @ wb.astype(jnp.float32).T
    assert actions_bf16.dtype == jnp.bfloat16
    assert jnp.allclose(actions_bf16.astype(jnp.float32), ref_bf16, atol=2e-2, rtol=2e-2)

    # --- multi-K-block path (f32 VMEM accumulator, exact zero-padding on K) -
    B2, A2, D2 = 24, 8, 2560
    k1, k2 = jax.random.split(jax.random.PRNGKey(1))
    bound2 = 1.0 / (D2 ** 0.5)
    w2 = jax.random.uniform(k1, (A2, D2), jnp.float32, minval=-bound2, maxval=bound2)
    x2 = jax.random.normal(k2, (B2, D2), jnp.float32)
    out2 = jax.block_until_ready(linear_forward(x2, w2))
    ref2 = x2 @ w2.T
    assert out2.shape == (B2, A2)
    assert jnp.allclose(out2, ref2, atol=2e-3, rtol=2e-3)

    print("KERNEL_OK")
</pallas_src>

<mosaic_0001>
module attributes {stable_mosaic.version = 11 : i64} {
  func.func @_linear_kernel_noacc(%arg0: i32, %arg1: i32, %arg2: i32, %arg3: memref<8x128xf32, #tpu.memory_space<vmem>>, %arg4: memref<4x128xf32, #tpu.memory_space<vmem>>, %arg5: memref<8x4xf32, #tpu.memory_space<vmem>>) attributes {dimension_semantics = [#tpu.dimension_semantics<parallel>, #tpu.dimension_semantics<parallel>, #tpu.dimension_semantics<arbitrary>], iteration_bounds = array<i64: 1, 1, 1>, scalar_prefetch = 0 : i64, scratch_operands = 0 : i64, tpu.core_type = #tpu.core_type<tc>, window_params = [{transform_indices = @transform_0, window_bounds = array<i64: 8, 128>}, {transform_indices = @transform_1, window_bounds = array<i64: 4, 128>}, {transform_indices = @transform_2, window_bounds = array<i64: 8, 4>}]} {
    %c0 = arith.constant 0 : index
    %c0_0 = arith.constant 0 : index
    %0 = vector.load %arg3[%c0, %c0_0] : memref<8x128xf32, #tpu.memory_space<vmem>>, vector<8x128xf32>
    %c0_1 = arith.constant 0 : index
    %c0_2 = arith.constant 0 : index
    %1 = vector.load %arg4[%c0_1, %c0_2] : memref<4x128xf32, #tpu.memory_space<vmem>>, vector<4x128xf32>
    %cst = arith.constant dense<0.000000e+00> : vector<8x4xf32>
    %2 = tpu.matmul %0, %1, %cst {dimension_numbers = #tpu.dot_dimension_numbers<[1], [1], [0], [0], [0, 0, 1, 0], [], []>} : vector<8x128xf32>, vector<4x128xf32>, vector<8x4xf32> -> vector<8x4xf32>
    %c0_3 = arith.constant 0 : index
    %c0_4 = arith.constant 0 : index
    %3 = vector.load %arg5[%c0_3, %c0_4] : memref<8x4xf32, #tpu.memory_space<vmem>>, vector<8x4xf32>
    tpu.vector_store %arg5[%c0_3, %c0_4], %2 {strides = array<i32>} : memref<8x4xf32, #tpu.memory_space<vmem>>, vector<8x4xf32>,
    return
  }
  func.func @transform_0(%arg0: i32, %arg1: i32, %arg2: i32) -> (i32, i32) {
    %c0_i32 = arith.constant 0 : i32
    return %arg0, %arg2 : i32, i32
  }
  func.func @transform_1(%arg0: i32, %arg1: i32, %arg2: i32) -> (i32, i32) {
    %c0_i32 = arith.constant 0 : i32
    return %arg1, %arg2 : i32, i32
  }
  func.func @transform_2(%arg0: i32, %arg1: i32, %arg2: i32) -> (i32, i32) {
    %c0_i32 = arith.constant 0 : i32
    return %arg0, %arg1 : i32, i32
  }
}

</mosaic_0001>

<bundles_post_ra>
// kernel: linear_forward.1
= control target key start
LH: loop header
LB: loop body
LE: loop exit
PB: predicated region body
PF: predicated region fallthrough
CT: control target
= control target key end

     0   :  { %7 = vsyncpa [#allocation3], 0  ;;  %s220_s0 = inlined_call_operand.hbm [shape: f32[8,128], index: 0, kind: input, shape index: {}]   ;;  %s221_s1 = inlined_call_operand.hbm [shape: f32[4,128], index: 1, kind: input, shape index: {}]   ;;  %s222_s2 = inlined_call_operand.vmem [shape: f32[8,4], index: 2, kind: output, shape index: {}]  }
   0x1   :  { %8 = vsyncpa [#allocation5], 0  ;;  %s174_s9 = smov [#allocation2]   ;;  %s175_s11 = smov [#allocation4]  }
   0x2   :  { %s15_s10 = sshll.u32 %s174_s9, 4  ;;  %s25_s12 = sshll.u32 %s175_s11, 4  ;;  %s16_s10 = int_to_ptr.vmem [resolvable:$true] %s15_s10  ;;  %s26_s12 = int_to_ptr.vmem [resolvable:$true] %s25_s12 }
   0x3   :  { %s126_s15 = scalar_lea.hbm %s220_s0, 128 }
   0x4   :  { %p127_p0 = scmp.ne.s32.totalorder %s220_s0, %s126_s15  ;;  %p130_p1 = scmp.lt.u32.totalorder %s126_s15, %s220_s0 }
   0x6   :  { %p132_p2 = pnand %p130_p1, %p127_p0 }
   0x8   :  { %135 = shalt.err (!%p132_p2)
}
   0x9   :  { %s136_s20 = scalar_lea.vmem %s16_s10, 128  ;;  %p141_p4 = scmp.lt.s32.totalorder %s16_s10, %s16_s10 }
   0xa   :  { %p137_p3 = scmp.ne.s32.totalorder %s16_s10, %s136_s20  ;;  %p142_p5 = scmp.lt.s32.totalorder %s136_s20, %s136_s20 }
   0xc   :  { %p143_p6 = por %p142_p5, %p141_p4 }
   0xe   :  { %p144_p7 = pnand %p143_p6, %p137_p3 }
  0x10   :  { %147 = shalt.err (!%p144_p7)
}
  0x11   :  { %18 = dma.hbm_to_vmem [thread:$0]  %s220_s0, 128, %s16_s10, [#allocation3]  }
  0x12   :  { %s148_s25 = scalar_lea.hbm %s221_s1, 64 }
  0x13   :  { %p149_p8 = scmp.ne.s32.totalorder %s221_s1, %s148_s25  ;;  %p152_p9 = scmp.lt.u32.totalorder %s148_s25, %s221_s1 }
  0x15   :  { %p154_p10 = pnand %p152_p9, %p149_p8 }
  0x17   :  { %157 = shalt.err (!%p154_p10)
}
  0x18   :  { %s158_s30 = scalar_lea.vmem %s26_s12, 64  ;;  %p163_p12 = scmp.lt.s32.totalorder %s26_s12, %s26_s12 }
  0x19   :  { %p159_p11 = scmp.ne.s32.totalorder %s26_s12, %s158_s30  ;;  %p164_p13 = scmp.lt.s32.totalorder %s158_s30, %s158_s30 }
  0x1b   :  { %p165_p0 = por %p164_p13, %p163_p12 }
  0x1d   :  { %p166_p1 = pnand %p165_p0, %p159_p11 }
  0x1f   :  { %169 = shalt.err (!%p166_p1)
}
  0x20   :  { %28 = dma.hbm_to_vmem [thread:$0]  %s221_s1, 64, %s26_s12, [#allocation5]  }
  0x21   :  { %170 = dma.done.wait [#allocation3], 128  }
  0x22   :  { %171 = vsyncadd [#allocation3], 4294967168 }
  0x23   :  { %172 = dma.done.wait [#allocation5], 64  }
  0x24   :  { %173 = vsyncadd [#allocation5], 4294967232  ;;  %v176_v0 = vmov 0.0   ;;  %vm177_vm0 = vmmov 0   ;;  %v36_v1 = vld [vmem:[#allocation4] sm:$0xf] }
  0x25   :  { %117 = vmatprep.subr.mxu0 %v176_v0  ;;  %119 = vmatprep.mubr.msk.f32.mxu0 %vm177_vm0, %v176_v0  ;;  %v35_v2 = vld [vmem:[#allocation2] sm:$0xff]  ;;  %vm107_vm1 = vcmask 31744  }
  0x26   :  { %118 = vmatpush3.xpose.msra.mxu0 %v36_v1 }
  0x29   :  { %120 = vmatmul.mubr.f32.vlgmr.msra.gmra.mrb[0].mxu0 %v35_v2 }
  0xfc   :  { %v103_v3 = vpop.f32.mrb[0].mxu0 }
  0xfd   :  { %108 = vst.msk [vmem:[%s222_s2] sm:$0xff] %vm107_vm1, %v103_v3  ;;  %v121_v4 = vpop.f32.mrb[1].mxu0 }
  0xfe   :  { %113 = vsyncpa [#allocation3], 1 }
  0xff   :  { %114 = vsyncpa [#allocation5], 1 }

</bundles_post_ra>
